<compile_context>
chip_gen: v6e
topology: v6e:2x2x1
jax: 0.10.0
libtpu: 0.0.40
codegen_flags: <defaults>
</compile_context>

<pallas_src>
import math
import numpy as np
import jax
import jax.numpy as jnp
from jax.experimental import pallas as pl
from jax.experimental.pallas import tpu as pltpu

_LANE = 128            # vreg lane width
_BASE_SUBLANE = 8      # vreg sublane count for 32-bit dtypes
_TARGET_BLOCK_BYTES = 2 << 20   # ~2 MiB/block: 2in+2out buffers = 8 MiB (fits v5e default)


def _gelu_f32(x):
    """Exact (erf-based) GELU on an f32 array, VALU/EUP-friendly."""
    inv_sqrt2 = 0.7071067811865476
    a1, a2, a3, a4, a5 = (0.254829592, -0.284496736, 1.421413741,
                          -1.453152027, 1.061405429)
    p = 0.3275911

    z = x * inv_sqrt2
    az = jnp.abs(z)
    d = 1.0 + p * az
    # EUP approximate reciprocal + one Newton-Raphson step -> full f32 accuracy
    # while keeping the divide off the vector-ALU slot.
    r = pl.reciprocal(d, approx=True)
    t = r * (2.0 - d * r)
    poly = t * (a1 + t * (a2 + t * (a3 + t * (a4 + t * a5))))
    e = 1.0 - poly * jnp.exp(-az * az)          # exp -> EUP
    erf = jnp.where(z >= 0, e, -e)
    return (x * 0.5) * (1.0 + erf)


def make_act_kernel(act_layer: str):
    if act_layer == "gelu":
        def kernel(x_ref, o_ref):
            x = x_ref[...].astype(jnp.float32)   # keep erf polynomial in f32
            o_ref[...] = _gelu_f32(x).astype(o_ref.dtype)
    elif act_layer == "leakyrelu":
        def kernel(x_ref, o_ref):
            x = x_ref[...]                        # native dtype (bf16-friendly)
            slope = jnp.asarray(0.2, dtype=x.dtype)
            o_ref[...] = jnp.maximum(x, x * slope)
    else:
        raise ValueError(f"unsupported act_layer: {act_layer}")
    return kernel


def custom_act_pallas(x, act_layer: str = "gelu"):
    """Apply CustomAct(act_layer) to `x` (any shape) with a Pallas TPU kernel."""
    orig_shape = x.shape
    total = x.size
    if total == 0:
        return x

    itemsize = jnp.dtype(x.dtype).itemsize
    sublane = _BASE_SUBLANE * max(1, 4 // itemsize)   # 8 f32 / 16 bf16 / 32 int8

    # Fold into a lane-dense (rows, 128) slab, padded (if needed) only up to
    # one dtype-aligned sublane group.
    rows_needed = pl.cdiv(total, _LANE)
    rows = pl.cdiv(rows_needed, sublane) * sublane
    padded_total = rows * _LANE

    flat = x.reshape(-1)
    aligned = (padded_total == total)
    if not aligned:
        # Ragged tail: bounded pad (< sublane*128 elems). act(0) == 0, and the
        # pad is sliced off afterwards.
        flat = jnp.pad(flat, (0, padded_total - total))
    x2d = flat.reshape(rows, _LANE)

    # Block sizing: ~2 MiB blocks, but always >= 2 grid steps when possible so
    # v7x's two TensorCores both get work on small/medium tensors.
    max_block_rows = max(sublane,
                         (_TARGET_BLOCK_BYTES // (_LANE * itemsize)) // sublane * sublane)
    min_blocks = 2 if rows >= 2 * sublane else 1
    num_blocks = max(pl.cdiv(rows, max_block_rows), min_blocks)
    block_rows = pl.cdiv(pl.cdiv(rows, num_blocks), sublane) * sublane
    block_rows = min(block_rows, rows)
    grid = (pl.cdiv(rows, block_rows),)   # last block may be ragged (masked store)

    out2d = pl.pallas_call(
        make_act_kernel(act_layer),
        out_shape=jax.ShapeDtypeStruct((rows, _LANE), x.dtype),
        grid_spec=pltpu.PrefetchScalarGridSpec(
            num_scalar_prefetch=0,
            grid=grid,
            in_specs=[pl.BlockSpec((block_rows, _LANE), lambda i: (i, 0))],
            out_specs=pl.BlockSpec((block_rows, _LANE), lambda i: (i, 0)),
        ),
        compiler_params=pltpu.CompilerParams(
            dimension_semantics=("parallel",),   # megacore sharding on v7x
        ),
    )(x2d)

    if aligned:
        return out2d.reshape(orig_shape)
    return out2d.reshape(-1)[:total].reshape(orig_shape)


def custom_act_reference(x, act_layer: str = "gelu"):
    """Pure-JAX reference mirroring the PyTorch CustomAct forward."""
    if act_layer == "gelu":
        return x * 0.5 * (1.0 + jax.scipy.special.erf(x / math.sqrt(2.0)))
    elif act_layer == "leakyrelu":
        return jnp.where(x >= 0, x, 0.2 * x)
    else:
        raise ValueError(f"unsupported act_layer: {act_layer}")


if __name__ == "__main__":
    key = jax.random.PRNGKey(0)
    x = jax.random.normal(key, (2, 4, 16, 16), dtype=jnp.float32)

    # gelu path (aligned fast path, 2 grid steps)
    out_gelu = jax.block_until_ready(custom_act_pallas(x, "gelu"))
    ref_gelu = custom_act_reference(x, "gelu")
    np.testing.assert_allclose(np.asarray(out_gelu), np.asarray(ref_gelu),
                               rtol=1e-5, atol=1e-5)

    # leakyrelu path
    out_lrelu = jax.block_until_ready(custom_act_pallas(x, "leakyrelu"))
    ref_lrelu = custom_act_reference(x, "leakyrelu")
    np.testing.assert_allclose(np.asarray(out_lrelu), np.asarray(ref_lrelu),
                               rtol=1e-6, atol=1e-6)

    # ragged shape (exercises the bounded-pad path)
    key2 = jax.random.PRNGKey(0)
    y = jax.random.normal(key2, (3, 5, 7), dtype=jnp.float32)
    out_y = jax.block_until_ready(custom_act_pallas(y, "gelu"))
    ref_y = custom_act_reference(y, "gelu")
    np.testing.assert_allclose(np.asarray(out_y), np.asarray(ref_y),
                               rtol=1e-5, atol=1e-5)

    print("KERNEL_OK")
</pallas_src>

<mosaic_0001>
module attributes {stable_mosaic.version = 11 : i64} {
  func.func @kernel(%arg0: i32, %arg1: memref<8x128xf32, #tpu.memory_space<vmem>>, %arg2: memref<8x128xf32, #tpu.memory_space<vmem>>) attributes {dimension_semantics = [#tpu.dimension_semantics<parallel>], iteration_bounds = array<i64: 2>, scalar_prefetch = 0 : i64, scratch_operands = 0 : i64, tpu.core_type = #tpu.core_type<tc>, window_params = [{transform_indices = @transform_0, window_bounds = array<i64: 8, 128>}, {transform_indices = @transform_1, window_bounds = array<i64: 8, 128>}]} {
    %c0 = arith.constant 0 : index
    %c0_0 = arith.constant 0 : index
    %0 = vector.load %arg1[%c0, %c0_0] : memref<8x128xf32, #tpu.memory_space<vmem>>, vector<8x128xf32>
    %cst = arith.constant 0.707106769 : f32
    %1 = vector.broadcast %cst : f32 to vector<8x128xf32>
    %2 = arith.mulf %0, %1 : vector<8x128xf32>
    %3 = math.absf %2 : vector<8x128xf32>
    %cst_1 = arith.constant 0.327591091 : f32
    %4 = vector.broadcast %cst_1 : f32 to vector<8x128xf32>
    %5 = arith.mulf %4, %3 : vector<8x128xf32>
    %cst_2 = arith.constant 1.000000e+00 : f32
    %6 = vector.broadcast %cst_2 : f32 to vector<8x128xf32>
    %7 = arith.addf %6, %5 : vector<8x128xf32>
    %8 = tpu.reciprocal %7 {approx = true} : vector<8x128xf32> -> vector<8x128xf32>
    %9 = arith.mulf %7, %8 : vector<8x128xf32>
    %cst_3 = arith.constant 2.000000e+00 : f32
    %10 = vector.broadcast %cst_3 : f32 to vector<8x128xf32>
    %11 = arith.subf %10, %9 : vector<8x128xf32>
    %12 = arith.mulf %8, %11 : vector<8x128xf32>
    %cst_4 = arith.constant 1.06140542 : f32
    %13 = vector.broadcast %cst_4 : f32 to vector<8x128xf32>
    %14 = arith.mulf %12, %13 : vector<8x128xf32>
    %cst_5 = arith.constant -1.45315206 : f32
    %15 = vector.broadcast %cst_5 : f32 to vector<8x128xf32>
    %16 = arith.addf %15, %14 : vector<8x128xf32>
    %17 = arith.mulf %12, %16 : vector<8x128xf32>
    %cst_6 = arith.constant 1.42141378 : f32
    %18 = vector.broadcast %cst_6 : f32 to vector<8x128xf32>
    %19 = arith.addf %18, %17 : vector<8x128xf32>
    %20 = arith.mulf %12, %19 : vector<8x128xf32>
    %cst_7 = arith.constant -0.284496725 : f32
    %21 = vector.broadcast %cst_7 : f32 to vector<8x128xf32>
    %22 = arith.addf %21, %20 : vector<8x128xf32>
    %23 = arith.mulf %12, %22 : vector<8x128xf32>
    %cst_8 = arith.constant 0.254829586 : f32
    %24 = vector.broadcast %cst_8 : f32 to vector<8x128xf32>
    %25 = arith.addf %24, %23 : vector<8x128xf32>
    %26 = arith.mulf %12, %25 : vector<8x128xf32>
    %cst_9 = arith.constant 0.000000e+00 : f32
    %27 = vector.broadcast %cst_9 : f32 to vector<8x128xf32>
    %28 = arith.subf %27, %3 : vector<8x128xf32>
    %29 = arith.mulf %28, %3 : vector<8x128xf32>
    %30 = math.exp %29 : vector<8x128xf32>
    %31 = arith.mulf %26, %30 : vector<8x128xf32>
    %cst_10 = arith.constant 1.000000e+00 : f32
    %32 = vector.broadcast %cst_10 : f32 to vector<8x128xf32>
    %33 = arith.subf %32, %31 : vector<8x128xf32>
    %cst_11 = arith.constant 0.000000e+00 : f32
    %34 = vector.broadcast %cst_11 : f32 to vector<8x128xf32>
    %35 = arith.cmpf oge, %2, %34 : vector<8x128xf32>
    %cst_12 = arith.constant 0.000000e+00 : f32
    %36 = vector.broadcast %cst_12 : f32 to vector<8x128xf32>
    %37 = arith.subf %36, %33 : vector<8x128xf32>
    %38 = arith.select %35, %33, %37 : vector<8x128xi1>, vector<8x128xf32>
    %cst_13 = arith.constant 5.000000e-01 : f32
    %39 = vector.broadcast %cst_13 : f32 to vector<8x128xf32>
    %40 = arith.mulf %0, %39 : vector<8x128xf32>
    %cst_14 = arith.constant 1.000000e+00 : f32
    %41 = vector.broadcast %cst_14 : f32 to vector<8x128xf32>
    %42 = arith.addf %41, %38 : vector<8x128xf32>
    %43 = arith.mulf %40, %42 : vector<8x128xf32>
    %c0_15 = arith.constant 0 : index
    %c0_16 = arith.constant 0 : index
    %44 = vector.load %arg2[%c0_15, %c0_16] : memref<8x128xf32, #tpu.memory_space<vmem>>, vector<8x128xf32>
    tpu.vector_store %arg2[%c0_15, %c0_16], %43 {strides = array<i32>} : memref<8x128xf32, #tpu.memory_space<vmem>>, vector<8x128xf32>,
    return
  }
  func.func @transform_0(%arg0: i32) -> (i32, i32) {
    %c0_i32 = arith.constant 0 : i32
    %c0_i32_0 = arith.constant 0 : i32
    return %arg0, %c0_i32 : i32, i32
  }
  func.func @transform_1(%arg0: i32) -> (i32, i32) {
    %c0_i32 = arith.constant 0 : i32
    %c0_i32_0 = arith.constant 0 : i32
    return %arg0, %c0_i32 : i32, i32
  }
}

</mosaic_0001>

<bundles_post_ra>
// kernel: tpu_custom_call.1
= control target key start
LH: loop header
LB: loop body
LE: loop exit
PB: predicated region body
PF: predicated region fallthrough
CT: control target
= control target key end

     0   :  { %6 = vsyncpa [#allocation3], 0  ;;  %s560_s0 = inlined_call_operand.hbm [shape: f32[16,128], index: 0, kind: input, shape index: {}]   ;;  %s561_s1 = inlined_call_operand.hbm [shape: f32[16,128], index: 1, kind: output, shape index: {}]  }
   0x1   :  { %8 = vsyncpa [#allocation3 + $0x1], 0 }
   0x2   :  { %9 = vsyncpa [#allocation4], 0 }
   0x3   :  { %11 = vsyncpa [#allocation4 + $0x1], 0  ;;  %s415_s6 = smov 0   ;;  %s417_s7 = smov 0  }
   0x4   :  { %s419_s8 = smov 0   ;;  %s421_s9 = smov 0  }
   0x5 LB: > { %s436_s10 = sadd.s32 4294967295, %s401_s9   ;;  %s247_s11 = sadd.s32 4294967294, %s401_s9   ;;  %s401_s9 = sphi %s421_s9, %s578_s9   ;;  %s397_s8 = sphi %s419_s8, %s577_s8   ;;  %s393_s7 = sphi %s417_s7, %s576_s7   ;;  %s389_s6 = sphi %s415_s6, %s575_s6  }
   0x6   : > { %s440_s12 = sadd.s32 1, %s401_s9   ;;  %s24_s13 = sadd.s32 1, %s397_s8 }
   0x7   : > { %s21_s14 = ssub.s32 %s401_s9, %s440_s12  ;;  %p31_p0 = scmp.ne.s32.totalorder %s397_s8, %s393_s7 }
   0x8   : > { %p22_p1 = scmp.eq.s32.totalorder %s21_s14, 0  ;;  %p32_p2 = scmp.eq.s32.totalorder %s401_s9, 0 }
   0x9   : > { %p37_p3 = scmp.ne.s32.totalorder %s393_s7, %s389_s6  ;;  %p38_p4 = scmp.eq.s32.totalorder %s436_s10, 0 }
   0xa   : > { %s452_s15 = scalar_select %p22_p1, %s397_s8, %s24_s13  }
   0xb   : > { %p454_p5 = por %p32_p2, %p31_p0  ;;  %p458_p6 = por %p38_p4, %p37_p3 }
   0xc   : > { %p61_p7 = scmp.eq.s32.totalorder %s436_s10, 1  ;;  %p67_p8 = scmp.eq.s32.totalorder %s247_s11, 1 }
   0xd   : > { %s565_s17 = scalar_select %p458_p6, 1, 0 }
   0xe   : > { %p271_p10 = scmp.lt.s32.totalorder %s401_s9, 2  ;;  %p465_p11 = por %p61_p7, %p31_p0 }
   0xf   : > { %p469_p12 = por %p67_p8, %p37_p3  ;;  %s87_s20 = sand.u32 1, %s397_s8  }
  0x10   : > { %s566_s18 = scalar_select %p465_p11, 1, 0 }
  0x11   : > { %s567_s19 = scalar_select %p469_p12, 1, 0 }
  0x12   : > { %s251_s21 = sshll.u32 %s401_s9, 7  ;;  %s250_s22 = sshll.u32 %s87_s20, 3 }
  0x13   : > { %s478_s25 = scalar_lea.hbm %s560_s0, %s251_s21  ;;  %s91_s26 = scalar_lea.vmem [#allocation2], %s250_s22 }
  0x14   : > { %s98_s27 = sshll.u32 %s91_s26, 4  ;;  %p482_p13 = pnand %p271_p10, %p454_p5  ;;  %s486_s27 = int_to_ptr.vmem [resolvable:$true] %s98_s27 }
  0x15   : > { %s88_s29 = scalar_lea.sflag [#allocation3], %s87_s20  ;;  %s309_s30 = scalar_lea.hbm %s478_s25, 128 }
  0x16   : > { %p310_p2 = scmp.ne.s32.totalorder %s478_s25, %s309_s30  ;;  %p311_p3 = pneg %p482_p13 }
  0x17   : > { %s314_s4 = scalar_lea.hbm %s560_s0, 256  ;;  %p315_p5 = scmp.lt.s32.totalorder %s478_s25, %s560_s0 }
  0x18   : > { %p312_p4 = pnand %p311_p3, %p310_p2  ;;  %p316_p8 = scmp.lt.s32.totalorder %s314_s4, %s309_s30 }
  0x1a   : > { %p313_p7 = pneg %p312_p4  ;;  %p317_p10 = por %p316_p8, %p315_p5 }
  0x1c   : > { %p318_p9 = pnand %p317_p10, %p313_p7 }
  0x1e   : > { %321 = shalt.err (!%p318_p9)
}
  0x1f   : > { %s322_s13 = scalar_lea.vmem %s486_s27, 128  ;;  %s403_s14 = smov [#allocation2]  }
  0x20   : > { %p323_p0 = scmp.ne.s32.totalorder %s486_s27, %s322_s13  ;;  %s327_s16 = sshll.u32 %s403_s14, 4  ;;  %s328_s16 = int_to_ptr.vmem [resolvable:$false] %s327_s16 }
  0x21   : > { %s329_s20 = scalar_lea.vmem %s328_s16, 256  ;;  %p330_p4 = scmp.lt.s32.totalorder %s486_s27, %s328_s16 }
  0x22   : > { %p325_p1 = pnand %p323_p0, %p311_p3  ;;  %p331_p12 = scmp.lt.s32.totalorder %s329_s20, %s322_s13 }
  0x24   : > { %p326_p2 = pneg %p325_p1  ;;  %p332_p11 = por %p331_p12, %p330_p4 }
  0x26   : > { %p333_p6 = pnand %p332_p11, %p326_p2 }
  0x28   : > { %336 = shalt.err (!%p333_p6)
}
  0x29   : > { %266 = dma.hbm_to_vmem [thread:$0]  (!%p482_p13), %s478_s25, 128, %s486_s27, %s88_s29  }
  0x2a   : > { %p569_p9 = scmp.lt.s32.totalorder %s401_s9, 3  ;;  %p570_p7 = scmp.ge.s32.totalorder %s401_s9, 1 }
  0x2c   : > { %p104_p0 = pnand %p570_p7, %p569_p9 }
  0x2d   : > { %s513_s21 = sand.u32 (!%p104_p0), 1, %s393_s7   ;;  %p571_p6 = scmp.ne.s32.totalorder (!%p104_p0), %s565_s17, 0 }
  0x2e   : > { %107 = sbr.rel (%p104_p0) target bundleno = 123 (0x7b), region = 24  ;;  %s253_s22 = sshll.u32 (!%p104_p0), %s513_s21, 3 }
  0x2f   : > { %s110_s23 = scalar_lea.sflag (!%p104_p0), [#allocation3], %s513_s21  ;;  %s113_s24 = scalar_lea.vmem (!%p104_p0), [#allocation2], %s253_s22 }
  0x33   : > { %380 = dma.done.wait (%p571_p6), %s110_s23, 128  }
  0x34   : > { %382 = vsyncadd (%p571_p6), %s110_s23, 4294967168  ;;  %v132_v0 = vld [vmem:[%s113_s24] sm:$0xff]  ;;  %s131_s17 = scalar_lea.vmem [#allocation5], %s253_s22  ;;  %s256_s26 = sshll.u32 %s436_s10, 7 }
  0x35   : > { %v133_v1 = vmul.f32 0.70710677, %v132_v0  ;;  %v159_v25 = vmul.f32 0.5, %v132_v0  ;;  %s177_s25 = sshll.u32 %s131_s17, 4  ;;  %s175_s29 = scalar_lea.hbm %s561_s1, %s256_s26  ;;  %s178_s25 = int_to_ptr.vmem [resolvable:$true] %s177_s25 }
  0x36   : > { %s164_s30 = scalar_lea.sflag [#allocation4], %s513_s21  ;;  %s337_s2 = scalar_lea.vmem %s178_s25, 128 }
  0x37   : > { %v134_v2 = vand.u32 2147483647, %v133_v1  ;;  %vm156_vm0 = vcmp.ge.f32.partialorder %v133_v1, 0.0  ;;  %p338_p11 = scmp.ne.s32.totalorder %s178_s25, %s337_s2  ;;  %p572_p12 = scmp.ne.s32.totalorder %s566_s18, 0 }
  0x38   : > { %s404_s3 = smov [#allocation5]  }
  0x39   : > { %v135_v3 = vmul.f32 0.3275911, %v134_v2  ;;  %v150_v5 = vsub.f32 0.0, %v134_v2  ;;  %p339_p13 = pnand %p338_p11, %p572_p12  ;;  %s341_s4 = sshll.u32 %s404_s3, 4  ;;  %s342_s4 = int_to_ptr.vmem [resolvable:$false] %s341_s4 }
  0x3a   : > { %s343_s5 = scalar_lea.vmem %s342_s4, 256  ;;  %p344_p3 = scmp.lt.s32.totalorder %s178_s25, %s342_s4 }
  0x3b   : > { %v136_v4 = vadd.f32 1.0, %v135_v3  ;;  %v151_v8 = vmul.f32 %v150_v5, %v134_v2  ;;  %p340_p1 = pneg %p339_p13  ;;  %p345_p5 = scmp.lt.s32.totalorder %s343_s5, %s337_s2 }
  0x3d   : > { %305 = vrcp.f32 %v136_v4  ;;  %v152_v11 = vmul.f32 1.442695, %v151_v8  ;;  %p346_p8 = por %p345_p5, %p344_p3 }
  0x3f   : > { %307 = vpow2.f32 %v152_v11  ;;  %p347_p10 = pnand %p346_p8, %p340_p1 }
  0x4a   : > { %v306_v6 = vpop.eup %305 }
  0x4b   : > { %v138_v7 = vmul.f32 %v306_v6, %v136_v4 }
  0x4c   : > { %v308_v20 = vpop.eup %307 }
  0x4d   : > { %v139_v9 = vsub.f32 2.0, %v138_v7 }
  0x4f   : > { %v140_v10 = vmul.f32 %v306_v6, %v139_v9 }
  0x51   : > { %v141_v12 = vmul.f32 1.0614054, %v140_v10 }
  0x53   : > { %v142_v13 = vadd.f32 -1.4531521, %v141_v12 }
  0x55   : > { %v143_v14 = vmul.f32 %v142_v13, %v140_v10 }
  0x57   : > { %v144_v15 = vadd.f32 1.4214138, %v143_v14 }
  0x59   : > { %v145_v16 = vmul.f32 %v144_v15, %v140_v10 }
  0x5b   : > { %v146_v17 = vadd.f32 -0.28449672, %v145_v16 }
  0x5d   : > { %v147_v18 = vmul.f32 %v146_v17, %v140_v10 }
  0x5f   : > { %v148_v19 = vadd.f32 0.2548296, %v147_v18 }
  0x61   : > { %v149_v21 = vmul.f32 %v148_v19, %v140_v10 }
  0x63   : > { %v154_v22 = vmul.f32 %v308_v20, %v149_v21 }
  0x65   : > { %v155_v23 = vsub.f32 1.0, %v154_v22 }
  0x67   : > { %v157_v24 = vsub.f32 0.0, %v155_v23 }
  0x69   : > { %v158_v26 = vsel %vm156_vm0, %v155_v23, %v157_v24 }
  0x6a   : > { %v160_v27 = vadd.f32 1.0, %v158_v26 }
  0x6c   : > { %v161_v28 = vmul.f32 %v160_v27, %v159_v25 }
  0x6e   : > { %162 = vst [vmem:[%s131_s17] sm:$0xff] %v161_v28 }
  0x6f   : > { %350 = shalt.err (!%p347_p10)
}
  0x70   : > { %s351_s10 = scalar_lea.hbm %s175_s29, 128  ;;  %s355_s14 = scalar_lea.hbm %s561_s1, 256 }
  0x71   : > { %p352_p2 = scmp.ne.s32.totalorder %s175_s29, %s351_s10  ;;  %p356_p7 = scmp.lt.s32.totalorder %s175_s29, %s561_s1 }
  0x72   : > { %p357_p0 = scmp.lt.s32.totalorder %s355_s14, %s351_s10 }
  0x73   : > { %p353_p4 = pnand %p352_p2, %p572_p12 }
  0x74   : > { %p358_p6 = por %p357_p0, %p356_p7 }
  0x75   : > { %p354_p9 = pneg %p353_p4 }
  0x77   : > { %p359_p11 = pnand %p358_p6, %p354_p9 }
  0x79   : > { %362 = shalt.err (!%p359_p11)
}
  0x7a   : > { %261 = dma.vmem_to_hbm [thread:$0]  (%p572_p12), %s178_s25, 128, %s175_s29, %s164_s30  }
  0x7b PF: > { %s189_s21 = sand.u32 1, %s389_s6   ;;  %p573_p13 = scmp.ne.s32.totalorder %s567_s19, 0 }
  0x7c   : > { %p574_p1 = scmp.ge.s32.totalorder %s401_s9, 2  ;;  %s190_s22 = scalar_lea.sflag [#allocation4], %s189_s21 }
  0x7e   : > { %p268_p3 = pnand %p574_p1, %p573_p13 }
  0x80   : > { %p269_p5 = pneg %p268_p3 }
  0x82   : > { %384 = dma.done.wait (%p269_p5), %s190_s22, 128  }
  0x83   : > { %386 = vsyncadd (%p269_p5), %s190_s22, 4294967168  ;;  %p14_p8 = scmp.ge.s32.totalorder %s440_s12, 4   ;;  %s575_s6 = smov %s393_s7 }
  0x84   : > { %s576_s7 = smov %s397_s8  ;;  %s577_s8 = smov %s452_s15 }
  0x85   : > { %s578_s9 = smov %s440_s12  ;;  %16 = sbr.rel (!%p14_p8) target bundleno = 5 (0x5), region = 69 }
  0x8a   :  { %195 = vsyncpa [#allocation3], 1 }
  0x8b   :  { %197 = vsyncpa [#allocation3 + $0x1], 1 }
  0x8c   :  { %198 = vsyncpa [#allocation4], 1 }
  0x8d   :  { %200 = vsyncpa [#allocation4 + $0x1], 1 }

</bundles_post_ra>
